<compile_context>
chip_gen: v5e
topology: v5e:2x2
jax: 0.10.0
libtpu: 0.0.40
codegen_flags: <defaults>
</compile_context>

<pallas_src>
import functools

import jax
import jax.numpy as jnp
from jax.experimental import pallas as pl
from jax.experimental.pallas import tpu as pltpu


def _complex_act_kernel(xr_ref, xi_ref, yr_ref, yi_ref, *, activation):
    # Pure elementwise VPU work on lane-dense (block_rows, lanes) tiles.
    yr_ref[...] = activation(xr_ref[...])
    yi_ref[...] = activation(xi_ref[...])


def complex_activation(x, activation=jax.nn.relu, *, lanes=512, max_block_rows=512):
    """activation(x.real) + 1j * activation(x.imag) for a complex input.

    `activation` is any elementwise jnp-traceable function (relu, tanh, ...),
    mirroring the `activation` callable the PyTorch module is constructed with.
    """
    assert jnp.iscomplexobj(x), "Input must be complex"
    xr, xi = x.real, x.imag          # complex split must stay in XLA
    dt = xr.dtype
    total = xr.size

    # Lane-dense 2-D layout: (rows, lanes); lanes is a multiple of 128.
    rows = -(-total // lanes)
    rows_aligned = -(-rows // 8) * 8                    # sublane multiple of 8
    block_rows = min(max_block_rows, rows_aligned)      # multiple of 8 by construction
    grid_n = -(-rows_aligned // block_rows)
    rows_final = grid_n * block_rows
    padded_total = rows_final * lanes

    def to2d(plane):
        flat = plane.reshape(-1)
        if padded_total != total:
            flat = jnp.pad(flat, (0, padded_total - total))
        return flat.reshape(rows_final, lanes)

    xr2, xi2 = to2d(xr), to2d(xi)

    spec = pl.BlockSpec((block_rows, lanes), lambda i: (i, 0))
    yr2, yi2 = pl.pallas_call(
        functools.partial(_complex_act_kernel, activation=activation),
        out_shape=(jax.ShapeDtypeStruct((rows_final, lanes), dt),
                   jax.ShapeDtypeStruct((rows_final, lanes), dt)),
        grid_spec=pl.GridSpec(
            grid=(grid_n,),
            in_specs=[spec, spec],
            out_specs=[spec, spec]),
        compiler_params=pltpu.CompilerParams(
            dimension_semantics=("parallel",),
            vmem_limit_bytes=64 << 20),
    )(xr2, xi2)

    def from2d(plane):
        return plane.reshape(-1)[:total].reshape(x.shape)

    return jax.lax.complex(from2d(yr2), from2d(yi2))


if __name__ == "__main__":
    key = jax.random.PRNGKey(0)
    k1, k2 = jax.random.split(key)

    # Small config consistent with a conv-net feature map: (N, C, H, W)
    N, C, H, W = 2, 4, 16, 16
    x = (jax.random.normal(k1, (N, C, H, W), jnp.float32)
         + 1j * jax.random.normal(k2, (N, C, H, W), jnp.float32))   # complex64 NCHW

    act = jax.nn.relu   # the `activation` the module is constructed with

    y = complex_activation(x, act)
    y = jax.block_until_ready(y)
    assert y.shape == x.shape and jnp.iscomplexobj(y)

    # Reference: the module's semantics computed directly in XLA.
    y_ref = act(x.real) + 1j * act(x.imag)
    assert jnp.allclose(y, y_ref, atol=1e-6, rtol=1e-6)

    print("KERNEL_OK")
</pallas_src>

<mosaic_0001>
module attributes {stable_mosaic.version = 11 : i64} {
  func.func @_complex_act_kernel(%arg0: i32, %arg1: memref<8x512xf32, #tpu.memory_space<vmem>>, %arg2: memref<8x512xf32, #tpu.memory_space<vmem>>, %arg3: memref<8x512xf32, #tpu.memory_space<vmem>>, %arg4: memref<8x512xf32, #tpu.memory_space<vmem>>) attributes {dimension_semantics = [#tpu.dimension_semantics<parallel>], iteration_bounds = array<i64: 1>, scalar_prefetch = 0 : i64, scratch_operands = 0 : i64, tpu.core_type = #tpu.core_type<tc>, window_params = [{transform_indices = @transform_0, window_bounds = array<i64: 8, 512>}, {transform_indices = @transform_1, window_bounds = array<i64: 8, 512>}, {transform_indices = @transform_2, window_bounds = array<i64: 8, 512>}, {transform_indices = @transform_3, window_bounds = array<i64: 8, 512>}]} {
    %c0 = arith.constant 0 : index
    %c0_0 = arith.constant 0 : index
    %0 = vector.load %arg1[%c0, %c0_0] : memref<8x512xf32, #tpu.memory_space<vmem>>, vector<8x512xf32>
    %cst = arith.constant 0.000000e+00 : f32
    %1 = vector.broadcast %cst : f32 to vector<8x512xf32>
    %2 = arith.maximumf %0, %1 : vector<8x512xf32>
    %c0_1 = arith.constant 0 : index
    %c0_2 = arith.constant 0 : index
    %3 = vector.load %arg3[%c0_1, %c0_2] : memref<8x512xf32, #tpu.memory_space<vmem>>, vector<8x512xf32>
    tpu.vector_store %arg3[%c0_1, %c0_2], %2 {strides = array<i32>} : memref<8x512xf32, #tpu.memory_space<vmem>>, vector<8x512xf32>,
    %c0_3 = arith.constant 0 : index
    %c0_4 = arith.constant 0 : index
    %4 = vector.load %arg2[%c0_3, %c0_4] : memref<8x512xf32, #tpu.memory_space<vmem>>, vector<8x512xf32>
    %cst_5 = arith.constant 0.000000e+00 : f32
    %5 = vector.broadcast %cst_5 : f32 to vector<8x512xf32>
    %6 = arith.maximumf %4, %5 : vector<8x512xf32>
    %c0_6 = arith.constant 0 : index
    %c0_7 = arith.constant 0 : index
    %7 = vector.load %arg4[%c0_6, %c0_7] : memref<8x512xf32, #tpu.memory_space<vmem>>, vector<8x512xf32>
    tpu.vector_store %arg4[%c0_6, %c0_7], %6 {strides = array<i32>} : memref<8x512xf32, #tpu.memory_space<vmem>>, vector<8x512xf32>,
    return
  }
  func.func @transform_0(%arg0: i32) -> (i32, i32) {
    %c0_i32 = arith.constant 0 : i32
    %c0_i32_0 = arith.constant 0 : i32
    return %arg0, %c0_i32 : i32, i32
  }
  func.func @transform_1(%arg0: i32) -> (i32, i32) {
    %c0_i32 = arith.constant 0 : i32
    %c0_i32_0 = arith.constant 0 : i32
    return %arg0, %c0_i32 : i32, i32
  }
  func.func @transform_2(%arg0: i32) -> (i32, i32) {
    %c0_i32 = arith.constant 0 : i32
    %c0_i32_0 = arith.constant 0 : i32
    return %arg0, %c0_i32 : i32, i32
  }
  func.func @transform_3(%arg0: i32) -> (i32, i32) {
    %c0_i32 = arith.constant 0 : i32
    %c0_i32_0 = arith.constant 0 : i32
    return %arg0, %c0_i32 : i32, i32
  }
}

</mosaic_0001>

<bundles_post_ra>
// kernel: tpu_custom_call.1
= control target key start
LH: loop header
LB: loop body
LE: loop exit
PB: predicated region body
PF: predicated region fallthrough
CT: control target
= control target key end

     0   :  { %9 = vsyncpa [#allocation3], 0  ;;  %s245_s0 = inlined_call_operand.hbm [shape: f32[8,512], index: 0, kind: input, shape index: {}]   ;;  %s246_s1 = inlined_call_operand.hbm [shape: f32[8,512], index: 1, kind: input, shape index: {}]   ;;  %s247_s2 = inlined_call_operand.hbm [shape: f32[8,512], index: 2, kind: output, shape index: {0}]   ;;  %s248_s3 = inlined_call_operand.hbm [shape: f32[8,512], index: 3, kind: output, shape index: {1}]  }
   0x1   :  { %10 = vsyncpa [#allocation6], 0 }
   0x2   :  { %11 = vsyncpa [#allocation4], 0 }
   0x3   :  { %12 = vsyncpa [#allocation9], 0  ;;  %s18_s14 = sshll.u32 %s245_s0, 4  ;;  %s209_s15 = smov [#allocation2]   ;;  %s19_s14 = int_to_ptr.hbm [resolvable:$true] %s18_s14 }
   0x4   :  { %s20_s16 = sshll.u32 %s209_s15, 4  ;;  %s29_s19 = sshll.u32 %s246_s1, 4  ;;  %s21_s16 = int_to_ptr.vmem [resolvable:$true] %s20_s16  ;;  %s30_s19 = int_to_ptr.hbm [resolvable:$true] %s29_s19 }
   0x5   :  { %23 = dma.hbm_to_vmem [thread:$0]  %s19_s14, 512, %s21_s16, [#allocation3]  }
   0x6   :  { %s210_s20 = smov [#allocation5]  }
   0x7   :  { %s31_s21 = sshll.u32 %s210_s20, 4  ;;  %s32_s21 = int_to_ptr.vmem [resolvable:$true] %s31_s21 }
   0x8   :  { %34 = dma.hbm_to_vmem [thread:$0]  %s30_s19, 512, %s32_s21, [#allocation6]  }
   0x9   :  { %201 = dma.done.wait [#allocation3], 512  }
   0xa   :  { %202 = vsyncadd [#allocation3], 4294966784 }
   0xb   :  { %203 = dma.done.wait [#allocation6], 512  }
   0xc   :  { %204 = vsyncadd [#allocation6], 4294966784  ;;  %v43_v0 = vld [vmem:[#allocation2] sm:$0xff]  ;;  %v44_v1 = vld [vmem:[#allocation2 + $0x8] sm:$0xff]  ;;  %s211_s0 = smov [#allocation7]   ;;  %s74_s25 = sshll.u32 %s247_s2, 4  ;;  %s75_s25 = int_to_ptr.hbm [resolvable:$true] %s74_s25 }
   0xd   :  { %v45_v2 = vld [vmem:[#allocation2 + $0x10] sm:$0xff]  ;;  %s72_s22 = sshll.u32 %s211_s0, 4  ;;  %v47_v3 = vmax.f32 %v43_v0, 0.0  ;;  %v48_v4 = vmax.f32 %v44_v1, 0.0  ;;  %v46_v6 = vld [vmem:[#allocation2 + $0x18] sm:$0xff]  ;;  %v55_v7 = vld [vmem:[#allocation5] sm:$0xff]  ;;  %s73_s22 = int_to_ptr.vmem [resolvable:$true] %s72_s22 }
   0xe   :  { %v49_v5 = vmax.f32 %v45_v2, 0.0  ;;  %v56_v8 = vld [vmem:[#allocation5 + $0x8] sm:$0xff]  ;;  %v50_v9 = vmax.f32 %v46_v6, 0.0  ;;  %v57_v10 = vld [vmem:[#allocation5 + $0x10] sm:$0xff]  ;;  %v59_v11 = vmax.f32 %v55_v7, 0.0  ;;  %v58_v12 = vld [vmem:[#allocation5 + $0x18] sm:$0xff] }
   0xf   :  { %51 = vst [vmem:[#allocation7] sm:$0xff] %v47_v3  ;;  %v60_v13 = vmax.f32 %v56_v8, 0.0  ;;  %v61_v14 = vmax.f32 %v57_v10, 0.0  ;;  %s212_s1 = smov [#allocation8]   ;;  %s85_s28 = sshll.u32 %s248_s3, 4  ;;  %v62_v15 = vmax.f32 %v58_v12, 0.0  ;;  %s86_s28 = int_to_ptr.hbm [resolvable:$true] %s85_s28 }
  0x10   :  { %52 = vst [vmem:[#allocation7 + $0x8] sm:$0xff] %v48_v4  ;;  %s83_s26 = sshll.u32 %s212_s1, 4  ;;  %s84_s26 = int_to_ptr.vmem [resolvable:$true] %s83_s26 }
  0x11   :  { %53 = vst [vmem:[#allocation7 + $0x10] sm:$0xff] %v49_v5 }
  0x12   :  { %54 = vst [vmem:[#allocation7 + $0x18] sm:$0xff] %v50_v9 }
  0x13   :  { %63 = vst [vmem:[#allocation8] sm:$0xff] %v59_v11  ;;  %77 = dma.vmem_to_hbm [thread:$0]  %s73_s22, 512, %s75_s25, [#allocation4]  }
  0x14   :  { %64 = vst [vmem:[#allocation8 + $0x8] sm:$0xff] %v60_v13 }
  0x15   :  { %65 = vst [vmem:[#allocation8 + $0x10] sm:$0xff] %v61_v14 }
  0x16   :  { %66 = vst [vmem:[#allocation8 + $0x18] sm:$0xff] %v62_v15 }
  0x17   :  { %88 = dma.vmem_to_hbm [thread:$0]  %s84_s26, 512, %s86_s28, [#allocation9]  }
  0x18   :  { %205 = dma.done.wait [#allocation4], 512  }
  0x19   :  { %206 = vsyncadd [#allocation4], 4294966784 }
  0x1a   :  { %207 = dma.done.wait [#allocation9], 512  }
  0x1b   :  { %208 = vsyncadd [#allocation9], 4294966784 }
  0x1c   :  { %97 = vsyncpa [#allocation3], 1 }
  0x1d   :  { %98 = vsyncpa [#allocation6], 1 }
  0x1e   :  { %99 = vsyncpa [#allocation4], 1 }
  0x1f   :  { %100 = vsyncpa [#allocation9], 1 }

</bundles_post_ra>
